<compile_context>
chip_gen: v5e
topology: v5e:2x2
jax: 0.10.0
libtpu: 0.0.40
codegen_flags: <defaults>
</compile_context>

<pallas_src>
import functools

import jax
import jax.numpy as jnp
from jax.experimental import pallas as pl
from jax.experimental.pallas import tpu as pltpu


def _cdiv(a: int, b: int) -> int:
    return (a + b - 1) // b


def _round_up(a: int, b: int) -> int:
    return _cdiv(a, b) * b


def _norm_kernel(x_ref, g_ref, b_ref, o_ref, *, epsilon: float):
    """Plain path: x_ref is (tile_rows, n_state); normalize over the last axis."""
    x = x_ref[...].astype(jnp.float32)
    u = jnp.mean(x, axis=-1, keepdims=True)
    xc = x - u
    s = jnp.mean(xc * xc, axis=-1, keepdims=True)
    y = xc * jax.lax.rsqrt(s + epsilon)
    y = y * g_ref[...].astype(jnp.float32) + b_ref[...].astype(jnp.float32)
    o_ref[...] = y.astype(o_ref.dtype)


def _norm_folded_kernel(x_ref, g_ref, b_ref, m_ref, o_ref, *, epsilon: float):
    """Folded path: k rows packed into the lane dim (L = k * n_state lanes).

    m_ref is a constant (L, L) block-diagonal segment-mean matrix; x @ m gives,
    at every lane position, the mean of its own n_state-wide segment.  This
    keeps all loads/stores 128-lane dense and uses the MXU (free slot) instead
    of cross-lane reshapes.
    """
    x = x_ref[...].astype(jnp.float32)  # (tr, L)
    m = m_ref[...]                      # (L, L) f32
    u = jnp.dot(x, m, preferred_element_type=jnp.float32,
                precision=jax.lax.Precision.HIGHEST)
    xc = x - u
    s = jnp.dot(xc * xc, m, preferred_element_type=jnp.float32,
                precision=jax.lax.Precision.HIGHEST)
    y = xc * jax.lax.rsqrt(s + epsilon)
    y = y * g_ref[...].astype(jnp.float32) + b_ref[...].astype(jnp.float32)
    o_ref[...] = y.astype(o_ref.dtype)


def norm(x, g, b, *, epsilon: float = 1e-5, tile_rows: int = 1024):
    """LayerNorm over the last axis, matching the PyTorch `Norm` module."""
    n_state = x.shape[-1]
    assert g.shape == (n_state,) and b.shape == (n_state,)

    orig_shape = x.shape
    x2d = x.reshape(-1, n_state)
    rows = x2d.shape[0]
    dtype = x.dtype
    dtype_bytes = jnp.dtype(dtype).itemsize
    # Sublane tile per dtype: f32 -> 8, bf16 -> 16, int8/fp8 -> 32.
    sub = {4: 8, 2: 16, 1: 32}.get(dtype_bytes, 8)

    # Fold k rows into lanes when n_state is narrow so stores are 128-lane dense.
    if n_state < 128 and 128 % n_state == 0:
        k = 128 // n_state
    else:
        k = 1
    lane_width = k * n_state

    # Generation-aware VMEM capacity (v7x: 64 MiB/TC, v5e/v6e: 128 MiB).
    try:
        vmem_cap = int(pltpu.get_tpu_info().vmem_capacity_bytes)
    except Exception:
        vmem_cap = 64 * 1024 * 1024  # conservative fallback (v7x per-TC)

    # Per-folded-row footprint: double-buffered in + out plus ~3 f32 temporaries.
    per_row = lane_width * (4 * dtype_bytes + 12)
    budget = int(0.6 * vmem_cap)
    tr_cap = max(sub, (budget // per_row) // sub * sub)
    tr = min(_round_up(tile_rows, sub), tr_cap)

    folded_rows = _cdiv(rows, k)
    if folded_rows <= tr:
        if folded_rows >= 2 * sub:
            # Keep at least 2 grid steps so both v7x TensorCores get work.
            tr = _round_up(_cdiv(folded_rows, 2), sub)
        else:
            tr = _round_up(folded_rows, sub)

    num_tiles = _cdiv(folded_rows, tr)
    padded_rows = num_tiles * tr * k
    if padded_rows != rows:
        # Zero padding is safe: rsqrt(0 + eps) is finite; padded rows are dropped.
        x2d = jnp.pad(x2d, ((0, padded_rows - rows), (0, 0)))
    x_f = x2d.reshape(num_tiles * tr, lane_width)

    g_f = jnp.tile(g, (k,)).reshape(1, lane_width)
    b_f = jnp.tile(b, (k,)).reshape(1, lane_width)

    # Scoped VMEM limit sized to the chosen tile (+ headroom), capped by capacity.
    needed = (4 * tr * lane_width * dtype_bytes      # double-buffered in + out
              + 3 * tr * lane_width * 4              # f32 compute temporaries
              + (2 * lane_width * lane_width * 4 if k > 1 else 0)
              + 4 * lane_width * dtype_bytes)        # resident g/b
    vmem_limit = int(min(0.75 * vmem_cap, max(needed + (8 << 20), 32 << 20)))

    cost = pl.CostEstimate(
        flops=int(8 * rows * n_state),
        transcendentals=int(rows),
        bytes_accessed=int(2 * rows * n_state * dtype_bytes),
    )

    row_spec = pl.BlockSpec((tr, lane_width), lambda i: (i, 0))
    const_spec = pl.BlockSpec((1, lane_width), lambda i: (0, 0))

    if k > 1:
        seg = jnp.arange(lane_width, dtype=jnp.int32) // n_state
        mmat = (seg[:, None] == seg[None, :]).astype(jnp.float32) / float(n_state)
        kernel = functools.partial(_norm_folded_kernel, epsilon=epsilon)
        in_specs = [row_spec, const_spec, const_spec,
                    pl.BlockSpec((lane_width, lane_width), lambda i: (0, 0))]
        args = (x_f, g_f, b_f, mmat)
    else:
        kernel = functools.partial(_norm_kernel, epsilon=epsilon)
        in_specs = [row_spec, const_spec, const_spec]
        args = (x_f, g_f, b_f)

    out_f = pl.pallas_call(
        kernel,
        out_shape=jax.ShapeDtypeStruct((num_tiles * tr, lane_width), dtype),
        grid_spec=pltpu.PrefetchScalarGridSpec(
            num_scalar_prefetch=0,
            grid=(num_tiles,),
            in_specs=in_specs,
            out_specs=row_spec,
        ),
        compiler_params=pltpu.CompilerParams(
            dimension_semantics=("parallel",),
            vmem_limit_bytes=vmem_limit,
        ),
        cost_estimate=cost,
    )(*args)

    out2d = out_f.reshape(padded_rows, n_state)
    if padded_rows != rows:
        out2d = out2d[:rows]
    return out2d.reshape(orig_shape)


def _reference_norm(x, g, b, epsilon=1e-5):
    u = jnp.mean(x, axis=-1, keepdims=True)
    s = jnp.mean(jnp.square(x - u), axis=-1, keepdims=True)
    y = (x - u) * jax.lax.rsqrt(s + epsilon)
    return y * g + b


if __name__ == "__main__":
    key = jax.random.PRNGKey(0)
    k1, k2 = jax.random.split(key)

    # Case 1: module defaults (g=ones, b=zeros), narrow hidden -> folded path.
    batch, seq, n_state = 2, 8, 32
    x = jax.random.normal(k1, (batch, seq, n_state), dtype=jnp.float32)
    g = jnp.ones((n_state,), dtype=jnp.float32)
    b = jnp.zeros((n_state,), dtype=jnp.float32)
    out = jax.block_until_ready(norm(x, g, b, epsilon=1e-5))
    ref = _reference_norm(x, g, b, epsilon=1e-5)
    assert out.shape == x.shape
    assert jnp.allclose(out, ref, atol=1e-5, rtol=1e-5)

    # Case 2: 128-wide hidden with a row count that needs padding -> plain path.
    rows2, n_state2 = 15, 128
    x2 = jax.random.normal(k2, (rows2, n_state2), dtype=jnp.float32)
    g2 = jnp.full((n_state2,), 1.5, dtype=jnp.float32)
    b2 = jnp.full((n_state2,), 0.25, dtype=jnp.float32)
    out2 = jax.block_until_ready(norm(x2, g2, b2, epsilon=1e-5))
    ref2 = _reference_norm(x2, g2, b2, epsilon=1e-5)
    assert out2.shape == x2.shape
    assert jnp.allclose(out2, ref2, atol=1e-5, rtol=1e-5)

    print("KERNEL_OK")
</pallas_src>

<mosaic_0001>
module attributes {stable_mosaic.version = 11 : i64} {
  func.func @_norm_folded_kernel(%arg0: i32, %arg1: memref<8x128xf32, #tpu.memory_space<vmem>>, %arg2: memref<1x128xf32, #tpu.memory_space<vmem>>, %arg3: memref<1x128xf32, #tpu.memory_space<vmem>>, %arg4: memref<128x128xf32, #tpu.memory_space<vmem>>, %arg5: memref<8x128xf32, #tpu.memory_space<vmem>>) attributes {dimension_semantics = [#tpu.dimension_semantics<parallel>], iteration_bounds = array<i64: 1>, scalar_prefetch = 0 : i64, scratch_operands = 0 : i64, tpu.core_type = #tpu.core_type<tc>, window_params = [{transform_indices = @transform_0, window_bounds = array<i64: 8, 128>}, {pipeline_mode = #tpu.pipeline_mode<synchronous>, transform_indices = @transform_1, window_bounds = array<i64: 1, 128>}, {pipeline_mode = #tpu.pipeline_mode<synchronous>, transform_indices = @transform_2, window_bounds = array<i64: 1, 128>}, {pipeline_mode = #tpu.pipeline_mode<synchronous>, transform_indices = @transform_3, window_bounds = array<i64: 128, 128>}, {transform_indices = @transform_4, window_bounds = array<i64: 8, 128>}]} {
    %c0 = arith.constant 0 : index
    %c0_0 = arith.constant 0 : index
    %0 = vector.load %arg1[%c0, %c0_0] : memref<8x128xf32, #tpu.memory_space<vmem>>, vector<8x128xf32>
    %c0_1 = arith.constant 0 : index
    %c0_2 = arith.constant 0 : index
    %1 = vector.load %arg4[%c0_1, %c0_2] : memref<128x128xf32, #tpu.memory_space<vmem>>, vector<128x128xf32>
    %cst = arith.constant dense<0.000000e+00> : vector<8x128xf32>
    %2 = tpu.matmul %0, %1, %cst {dimension_numbers = #tpu.dot_dimension_numbers<[1], [0], [0], [1], [0, 0, 1, 1], [], []>, precision = #tpu.contract_precision<fp32>} : vector<8x128xf32>, vector<128x128xf32>, vector<8x128xf32> -> vector<8x128xf32>
    %3 = arith.subf %0, %2 : vector<8x128xf32>
    %4 = arith.mulf %3, %3 : vector<8x128xf32>
    %cst_3 = arith.constant dense<0.000000e+00> : vector<8x128xf32>
    %5 = tpu.matmul %4, %1, %cst_3 {dimension_numbers = #tpu.dot_dimension_numbers<[1], [0], [0], [1], [0, 0, 1, 1], [], []>, precision = #tpu.contract_precision<fp32>} : vector<8x128xf32>, vector<128x128xf32>, vector<8x128xf32> -> vector<8x128xf32>
    %cst_4 = arith.constant 9.99999974E-6 : f32
    %6 = vector.broadcast %cst_4 : f32 to vector<8x128xf32>
    %7 = arith.addf %5, %6 : vector<8x128xf32>
    %8 = math.rsqrt %7 : vector<8x128xf32>
    %9 = arith.mulf %3, %8 : vector<8x128xf32>
    %c0_5 = arith.constant 0 : index
    %c0_6 = arith.constant 0 : index
    %10 = vector.load %arg2[%c0_5, %c0_6] : memref<1x128xf32, #tpu.memory_space<vmem>>, vector<1x128xf32>
    %11 = vector.broadcast %10 : vector<1x128xf32> to vector<8x128xf32>
    %12 = arith.mulf %9, %11 : vector<8x128xf32>
    %c0_7 = arith.constant 0 : index
    %c0_8 = arith.constant 0 : index
    %13 = vector.load %arg3[%c0_7, %c0_8] : memref<1x128xf32, #tpu.memory_space<vmem>>, vector<1x128xf32>
    %14 = vector.broadcast %13 : vector<1x128xf32> to vector<8x128xf32>
    %15 = arith.addf %12, %14 : vector<8x128xf32>
    %c0_9 = arith.constant 0 : index
    %c0_10 = arith.constant 0 : index
    %16 = vector.load %arg5[%c0_9, %c0_10] : memref<8x128xf32, #tpu.memory_space<vmem>>, vector<8x128xf32>
    tpu.vector_store %arg5[%c0_9, %c0_10], %15 {strides = array<i32>} : memref<8x128xf32, #tpu.memory_space<vmem>>, vector<8x128xf32>,
    return
  }
  func.func @transform_0(%arg0: i32) -> (i32, i32) {
    %c0_i32 = arith.constant 0 : i32
    %c0_i32_0 = arith.constant 0 : i32
    return %arg0, %c0_i32 : i32, i32
  }
  func.func @transform_1(%arg0: i32) -> (i32, i32) {
    %c0_i32 = arith.constant 0 : i32
    %c0_i32_0 = arith.constant 0 : i32
    %c0_i32_1 = arith.constant 0 : i32
    return %c0_i32, %c0_i32_0 : i32, i32
  }
  func.func @transform_2(%arg0: i32) -> (i32, i32) {
    %c0_i32 = arith.constant 0 : i32
    %c0_i32_0 = arith.constant 0 : i32
    %c0_i32_1 = arith.constant 0 : i32
    return %c0_i32, %c0_i32_0 : i32, i32
  }
  func.func @transform_3(%arg0: i32) -> (i32, i32) {
    %c0_i32 = arith.constant 0 : i32
    %c0_i32_0 = arith.constant 0 : i32
    %c0_i32_1 = arith.constant 0 : i32
    return %c0_i32, %c0_i32_0 : i32, i32
  }
  func.func @transform_4(%arg0: i32) -> (i32, i32) {
    %c0_i32 = arith.constant 0 : i32
    %c0_i32_0 = arith.constant 0 : i32
    return %arg0, %c0_i32 : i32, i32
  }
}

</mosaic_0001>

<bundles_post_ra>
// kernel: tpu_custom_call.1
= control target key start
LH: loop header
LB: loop body
LE: loop exit
PB: predicated region body
PF: predicated region fallthrough
CT: control target
= control target key end

     0   :  { %9 = vsyncpa [#allocation3], 0  ;;  %s1355_s0 = inlined_call_operand.hbm [shape: f32[8,128], index: 0, kind: input, shape index: {}]   ;;  %s1356_s1 = inlined_call_operand.hbm [shape: f32[1,128], index: 1, kind: input, shape index: {}]   ;;  %s1357_s2 = inlined_call_operand.vmem [shape: f32[1,128], index: 2, kind: input, shape index: {}]   ;;  %s1358_s3 = inlined_call_operand.hbm [shape: f32[128,128], index: 3, kind: input, shape index: {}]   ;;  %s1359_s4 = inlined_call_operand.hbm [shape: f32[8,128], index: 4, kind: output, shape index: {}]  }
   0x1   :  { %10 = vsyncpa [#allocation6], 0  ;;  %s28_s17 = sshll.u32 %s1356_s1, 4  ;;  %s29_s17 = int_to_ptr.hbm [resolvable:$true] %s28_s17 }
   0x2   :  { %11 = vsyncpa [#allocation4], 0  ;;  %s914_s18 = smov [#allocation5]   ;;  %s17_s22 = sshll.u32 %s1355_s0, 4  ;;  %s18_s22 = int_to_ptr.hbm [resolvable:$true] %s17_s22 }
   0x3   :  { %s30_s19 = sshll.u32 %s914_s18, 4  ;;  %s915_s23 = smov [#allocation2]   ;;  %s31_s19 = int_to_ptr.vmem [resolvable:$true] %s30_s19 }
   0x4   :  { %33 = dma.hbm_to_vmem [thread:$0]  %s29_s17, 16, %s31_s19, [#allocation6]  }
   0x5   :  { %s19_s24 = sshll.u32 %s915_s23, 4  ;;  %s40_s27 = sshll.u32 %s1358_s3, 4  ;;  %s20_s24 = int_to_ptr.vmem [resolvable:$true] %s19_s24  ;;  %s41_s27 = int_to_ptr.hbm [resolvable:$true] %s40_s27 }
   0x6   :  { %22 = dma.hbm_to_vmem [thread:$0]  %s18_s22, 128, %s20_s24, [#allocation3]  }
   0x7   :  { %s916_s1 = smov [#allocation7]   ;;  %s917_s29 = smov 128  }
   0x8   :  { %s42_s28 = sshll.u32 %s916_s1, 4  ;;  %s918_s30 = smov 8   ;;  %s43_s28 = int_to_ptr.vmem [resolvable:$true] %s42_s28 }
   0x9   :  { %48 = dma.hbm_to_vmem [thread:$0]  %s41_s27, 2048, %s43_s28, [#allocation6], %s917_s29, %s917_s29, %s918_s30  }
   0xa   :  { %908 = dma.done.wait [#allocation3], 128  }
   0xb   :  { %909 = vsyncadd [#allocation3], 4294967168 }
   0xc   :  { %910 = dma.done.wait [#allocation6], 2064  }
   0xd   :  { %911 = vsyncadd [#allocation6], 4294965232  ;;  %v77_v0 = vld [vmem:[#allocation7 + $0x78] sm:$0xff]  ;;  %v76_v1 = vld [vmem:[#allocation7 + $0x70] sm:$0xff]  ;;  %s919_s5 = smov [#allocation8]   ;;  %s791_s9 = sshll.u32 %s1359_s4, 4  ;;  %s792_s9 = int_to_ptr.hbm [resolvable:$true] %s791_s9 }
   0xe   :  { %v75_v2 = vld [vmem:[#allocation7 + $0x68] sm:$0xff]  ;;  %v954_v3 = vand.u32 4294901760, %v77_v0  ;;  %v956_v4 = vand.u32 4294901760, %v76_v1  ;;  %v74_v6 = vld [vmem:[#allocation7 + $0x60] sm:$0xff]  ;;  %v73_v7 = vld [vmem:[#allocation7 + $0x58] sm:$0xff]  ;;  %s789_s6 = sshll.u32 %s919_s5, 4  ;;  %s790_s6 = int_to_ptr.vmem [resolvable:$true] %s789_s6 }
   0xf   :  { %v958_v5 = vand.u32 4294901760, %v75_v2  ;;  %v72_v8 = vld [vmem:[#allocation7 + $0x50] sm:$0xff]  ;;  %v960_v9 = vand.u32 4294901760, %v74_v6  ;;  %v962_v10 = vand.u32 4294901760, %v73_v7  ;;  %v71_v12 = vld [vmem:[#allocation7 + $0x48] sm:$0xff]  ;;  %v70_v13 = vld [vmem:[#allocation7 + $0x40] sm:$0xff] }
  0x10   :  { %v964_v11 = vand.u32 4294901760, %v72_v8  ;;  %79 = vmatpush.msra.mxu0 %v954_v3  ;;  %v968_v14 = vsub.f32 %v77_v0, %v954_v3  ;;  %v971_v15 = vsub.f32 %v76_v1, %v956_v4  ;;  %v976_v17 = vand.u32 4294901760, %v71_v12  ;;  %v69_v18 = vld [vmem:[#allocation7 + $0x38] sm:$0xff]  ;;  %275 = vmatpush.msra.mxu3 %v954_v3  ;;  %v68_v26 = vld [vmem:[#allocation7 + $0x30] sm:$0xff]  ;;  %v67_v36 = vld [vmem:[#allocation7 + $0x28] sm:$0xff] }
  0x11   :  { %v974_v16 = vsub.f32 %v75_v2, %v958_v5  ;;  %v980_v19 = vsub.f32 %v74_v6, %v960_v9  ;;  %v983_v20 = vsub.f32 %v73_v7, %v962_v10  ;;  %v998_v25 = vand.u32 4294901760, %v70_v13  ;;  %v66_v42 = vld [vmem:[#allocation7 + $0x20] sm:$0xff]  ;;  %v65_v47 = vld [vmem:[#allocation7 + $0x18] sm:$0xff]  ;;  %v64_v55 = vld [vmem:[#allocation7 + $0x10] sm:$0xff] }
  0x12   :  { %v986_v21 = vsub.f32 %v72_v8, %v964_v11  ;;  %81 = vmatpush.msra.mxu0 %v956_v4  ;;  %v990_v22 = vand.u32 4294901760, %v968_v14  ;;  %v993_v23 = vand.u32 4294901760, %v971_v15  ;;  %222 = vmatpush.msra.mxu2 %v968_v14  ;;  %v1004_v28 = vand.u32 4294901760, %v69_v18  ;;  %v63_v60 = vld [vmem:[#allocation7 + $0x8] sm:$0xff]  ;;  %v62_v1 = vld [vmem:[#allocation7] sm:$0xff]  ;;  %v1108_v7 = vld [vmem:[#allocation2] sm:$0xff] }
  0x13   :  { %v996_v24 = vand.u32 4294901760, %v974_v16  ;;  %v1002_v27 = vand.u32 4294901760, %v980_v19  ;;  %v1007_v29 = vsub.f32 %v71_v12, %v976_v17  ;;  %277 = vmatpush.msra.mxu3 %v956_v4  ;;  %v1018_v33 = vand.u32 4294901760, %v983_v20  ;;  %1374 = vst [vmem:[#allocation18_spill] sm:$0xff] %v1108_v7 }
  0x14   :  { %83 = vmatpush.msra.mxu0 %v958_v5  ;;  %v122_v30 = vsub.f32 %v968_v14, %v990_v22  ;;  %v128_v31 = vsub.f32 %v971_v15, %v993_v23  ;;  %225 = vmatpush.msra.mxu2 %v971_v15  ;;  %v1022_v34 = vand.u32 4294901760, %v986_v21  ;;  %v1024_v35 = vand.u32 4294901760, %v68_v26 }
  0x15   :  { %v134_v32 = vsub.f32 %v974_v16, %v996_v24  ;;  %279 = vmatpush.msra.mxu3 %v958_v5  ;;  %v140_v39 = vsub.f32 %v980_v19, %v1002_v27  ;;  %v1035_v40 = vsub.f32 %v70_v13, %v998_v25  ;;  %v1039_v41 = vand.u32 4294901760, %v1007_v29 }
  0x16   :  { %v1027_v37 = vand.u32 4294901760, %v122_v30  ;;  %85 = vmatpush.msra.mxu0 %v960_v9  ;;  %v1030_v38 = vand.u32 4294901760, %v128_v31  ;;  %228 = vmatpush.msra.mxu2 %v974_v16  ;;  %v146_v44 = vsub.f32 %v983_v20, %v1018_v33  ;;  %v1048_v45 = vand.u32 4294901760, %v67_v36 }
  0x17   :  { %1368 = vst [vmem:[#allocation12_spill] sm:$0xff] %v1035_v40  ;;  %281 = vmatpush.msra.mxu3 %v960_v9  ;;  %v1044_v43 = vand.u32 4294901760, %v134_v32  ;;  %v1051_v46 = vsub.f32 %v69_v18, %v1004_v28  ;;  %v152_v48 = vsub.f32 %v986_v21, %v1022_v34  ;;  %v1059_v49 = vand.u32 4294901760, %v140_v39 }
  0x18   :  { %124 = vmatpush.msra.mxu1 %v1027_v37  ;;  %87 = vmatpush.msra.mxu0 %v962_v10  ;;  %v1062_v50 = vand.u32 4294901760, %v1035_v40  ;;  %v1064_v51 = vand.u32 4294901760, %v66_v42  ;;  %v1067_v52 = vsub.f32 %v68_v26, %v1024_v35  ;;  %v158_v53 = vsub.f32 %v1007_v29, %v1039_v41 }
  0x19   :  { %1369 = vst [vmem:[#allocation13_spill] sm:$0xff] %v1051_v46  ;;  %231 = vmatpush.msra.mxu2 %v980_v19  ;;  %283 = vmatpush.msra.mxu3 %v962_v10  ;;  %v1071_v54 = vand.u32 4294901760, %v65_v47  ;;  %v1077_v56 = vand.u32 4294901760, %v146_v44  ;;  %v1080_v57 = vand.u32 4294901760, %v1051_v46  ;;  %v1083_v58 = vsub.f32 %v67_v36, %v1048_v45 }
  0x1a   :  { %130 = vmatpush.msra.mxu1 %v1030_v38  ;;  %89 = vmatpush.msra.mxu0 %v964_v11  ;;  %1370 = vst [vmem:[#allocation14_spill] sm:$0xff] %v1067_v52  ;;  %v1085_v59 = vand.u32 4294901760, %v152_v48  ;;  %v164_v61 = vsub.f32 %v1035_v40, %v1062_v50  ;;  %v1094_v62 = vand.u32 4294901760, %v1067_v52  ;;  %v1096_v63 = vand.u32 4294901760, %v64_v55 }
  0x1b   :  { %234 = vmatpush.msra.mxu2 %v983_v20  ;;  %285 = vmatpush.msra.mxu3 %v964_v11  ;;  %1371 = vst [vmem:[#allocation15_spill] sm:$0xff] %v1083_v58  ;;  %v1099_v0 = vsub.f32 %v66_v42, %v1064_v51  ;;  %v1101_v2 = vand.u32 4294901760, %v158_v53  ;;  %v1104_v6 = vsub.f32 %v65_v47, %v1071_v54  ;;  %v1115_v12 = vand.u32 4294901760, %v1083_v58 }
  0x1c   :  { %136 = vmatpush.msra.mxu1 %v1044_v43  ;;  %91 = vmatpush.msra.mxu0 %v976_v17  ;;  %v170_v8 = vsub.f32 %v1051_v46, %v1080_v57  ;;  %v1117_v13 = vand.u32 4294901760, %v63_v60  ;;  %v1120_v18 = vand.u32 4294901760, %v1108_v7  ;;  %v1122_v26 = vand.u32 4294901760, %v62_v1 }
  0x1d   :  { %237 = vmatpush.msra.mxu2 %v986_v21  ;;  %287 = vmatpush.msra.mxu3 %v976_v17  ;;  %1372 = vst [vmem:[#allocation16_spill] sm:$0xff] %v1099_v0  ;;  %v1128_v30 = vand.u32 4294901760, %v164_v61  ;;  %v176_v31 = vsub.f32 %v1067_v52, %v1094_v62  ;;  %v1133_v32 = vand.u32 4294901760, %v1099_v0  ;;  %v1136_v36 = vsub.f32 %v64_v55, %v1096_v63 }
  0x1e   :  { %142 = vmatpush.msra.mxu1 %v1059_v49  ;;  %93 = vmatpush.msra.mxu0 %v998_v25  ;;  %1373 = vst [vmem:[#allocation17_spill] sm:$0xff] %v1104_v6  ;;  %v1139_v39 = vand.u32 4294901760, %v1104_v6  ;;  %v1145_v42 = vand.u32 4294901760, %v170_v8  ;;  %v182_v44 = vsub.f32 %v1083_v58, %v1115_v12  ;;  %v1150_v47 = vsub.f32 %v63_v60, %v1117_v13 }
  0x1f   :  { %240 = vmatpush.msra.mxu2 %v1007_v29  ;;  %289 = vmatpush.msra.mxu3 %v998_v25  ;;  %1375 = vst [vmem:[#allocation19_spill] sm:$0xff] %v1136_v36  ;;  %v111_v48 = vsub.f32 %v1108_v7, %v1120_v18  ;;  %v1158_v53 = vand.u32 4294901760, %v176_v31  ;;  %v188_v55 = vsub.f32 %v1099_v0, %v1133_v32  ;;  %v1163_v61 = vand.u32 4294901760, %v1136_v36 }
  0x20   :  { %148 = vmatpush.msra.mxu1 %v1077_v56  ;;  %95 = vmatpush.msra.mxu0 %v1004_v28  ;;  %v1166_v60 = vsub.f32 %v62_v1, %v1122_v26  ;;  %v1172_v8 = vand.u32 4294901760, %v182_v44  ;;  %v194_v31 = vsub.f32 %v1104_v6, %v1139_v39  ;;  %v1177_v7 = vand.u32 4294901760, %v1150_v47 }
  0x21   :  { %243 = vmatpush.msra.mxu2 %v1035_v40  ;;  %291 = vmatpush.msra.mxu3 %v1004_v28  ;;  %v1183_v1 = vand.u32 4294901760, %v188_v55  ;;  %v200_v44 = vsub.f32 %v1136_v36, %v1163_v61 }
  0x22   :  { %154 = vmatpush.msra.mxu1 %v1085_v59  ;;  %97 = vmatpush.msra.mxu0 %v1024_v35  ;;  %v206_v55 = vsub.f32 %v1150_v47, %v1177_v7 }
  0x23   :  { %246 = vmatpush.msra.mxu2 %v1051_v46  ;;  %293 = vmatpush.msra.mxu3 %v1024_v35 }
  0x24   :  { %160 = vmatpush.msra.mxu1 %v1101_v2  ;;  %99 = vmatpush.msra.mxu0 %v1048_v45 }
  0x25   :  { %249 = vmatpush.msra.mxu2 %v1067_v52  ;;  %295 = vmatpush.msra.mxu3 %v1048_v45  ;;  %v112_v52 = vand.u32 4294901760, %v111_v48 }
  0x26   :  { %166 = vmatpush.msra.mxu1 %v1128_v30  ;;  %101 = vmatpush.msra.mxu0 %v1064_v51 }
  0x27   :  { %252 = vmatpush.msra.mxu2 %v1083_v58  ;;  %297 = vmatpush.msra.mxu3 %v1064_v51  ;;  %v1188_v58 = vand.u32 4294901760, %v1166_v60  ;;  %v113_v46 = vsub.f32 %v111_v48, %v112_v52 }
  0x28   :  { %172 = vmatpush.msra.mxu1 %v1145_v42  ;;  %103 = vmatpush.msra.mxu0 %v1071_v54 }
  0x29   :  { %255 = vmatpush.msra.mxu2 %v1099_v0  ;;  %299 = vmatpush.msra.mxu3 %v1071_v54  ;;  %v1194_v0 = vand.u32 4294901760, %v194_v31  ;;  %v212_v40 = vsub.f32 %v1166_v60, %v1188_v58  ;;  %v1209_v31 = vand.u32 4294901760, %v206_v55 }
  0x2a   :  { %178 = vmatpush.msra.mxu1 %v1158_v53  ;;  %105 = vmatpush.msra.mxu0 %v1096_v63 }
  0x2b   :  { %258 = vmatpush.msra.mxu2 %v1104_v6  ;;  %301 = vmatpush.msra.mxu3 %v1096_v63  ;;  %v1202_v6 = vand.u32 4294901760, %v200_v44  ;;  %v1215_v44 = vand.u32 4294901760, %v212_v40 }
  0x2c   :  { %184 = vmatpush.msra.mxu1 %v1172_v8  ;;  %107 = vmatpush.msra.mxu0 %v1117_v13 }
  0x2d   :  { %261 = vmatpush.msra.mxu2 %v1136_v36  ;;  %303 = vmatpush.msra.mxu3 %v1117_v13  ;;  %v114_v36 = vand.u32 4294901760, %v113_v46 }
  0x2e   :  { %190 = vmatpush.msra.mxu1 %v1183_v1  ;;  %109 = vmatpush.msra.mxu0 %v1122_v26 }
  0x2f   :  { %264 = vmatpush.msra.mxu2 %v1150_v47  ;;  %305 = vmatpush.msra.mxu3 %v1122_v26 }
  0x30   :  { %316 = vmatpush.msrb.mxu0 %v990_v22  ;;  %196 = vmatpush.msra.mxu1 %v1194_v0 }
  0x31   :  { %267 = vmatpush.msra.mxu2 %v1166_v60  ;;  %309 = vmatmul.f32.vlgmr.msra.gmra.mxu3 %v112_v52 }
  0x32   :  { %320 = vmatpush.msrb.mxu0 %v993_v23  ;;  %202 = vmatpush.msra.mxu1 %v1202_v6 }
  0x33   :  { %270 = vmatmul.f32.vlgmr.msra.gmra.mxu2 %v111_v48  ;;  %115 = vmatmul.f32.vlgmr.msra.gmra.mxu0 %v114_v36 }
  0x34   :  { %324 = vmatpush.msrb.mxu0 %v996_v24  ;;  %208 = vmatpush.msra.mxu1 %v1209_v31 }
  0x35   :  { %467 = vmatpush.msrb.mxu3 %v1027_v37  ;;  %422 = vmatpush.msrb.mxu2 %v954_v3 }
  0x36   :  { %328 = vmatpush.msrb.mxu0 %v1002_v27  ;;  %214 = vmatpush.msra.mxu1 %v1215_v44 }
  0x37   :  { %216 = vmatmul.f32.vlgmr.msra.gmra.mxu1 %v1120_v18  ;;  %473 = vmatpush.msrb.mxu3 %v1030_v38 }
  0x38   :  { %383 = vmatpush.msrb.mxu1 %v954_v3  ;;  %332 = vmatpush.msrb.mxu0 %v1018_v33 }
  0x39   :  { %479 = vmatpush.msrb.mxu3 %v1044_v43  ;;  %424 = vmatpush.msrb.mxu2 %v956_v4 }
  0x3a   :  { %385 = vmatpush.msrb.mxu1 %v956_v4  ;;  %336 = vmatpush.msrb.mxu0 %v1022_v34 }
  0x3b   :  { %485 = vmatpush.msrb.mxu3 %v1059_v49  ;;  %426 = vmatpush.msrb.mxu2 %v958_v5 }
  0x3c   :  { %387 = vmatpush.msrb.mxu1 %v958_v5  ;;  %340 = vmatpush.msrb.mxu0 %v1039_v41 }
  0x3d   :  { %491 = vmatpush.msrb.mxu3 %v1077_v56  ;;  %428 = vmatpush.msrb.mxu2 %v960_v9 }
  0x3e   :  { %389 = vmatpush.msrb.mxu1 %v960_v9  ;;  %344 = vmatpush.msrb.mxu0 %v1062_v50 }
  0x3f   :  { %497 = vmatpush.msrb.mxu3 %v1085_v59  ;;  %430 = vmatpush.msrb.mxu2 %v962_v10 }
  0x40   :  { %391 = vmatpush.msrb.mxu1 %v962_v10  ;;  %348 = vmatpush.msrb.mxu0 %v1080_v57 }
  0x41   :  { %503 = vmatpush.msrb.mxu3 %v1101_v2  ;;  %432 = vmatpush.msrb.mxu2 %v964_v11 }
  0x42   :  { %393 = vmatpush.msrb.mxu1 %v964_v11  ;;  %352 = vmatpush.msrb.mxu0 %v1094_v62 }
  0x43   :  { %509 = vmatpush.msrb.mxu3 %v1128_v30  ;;  %434 = vmatpush.msrb.mxu2 %v976_v17 }
  0x44   :  { %395 = vmatpush.msrb.mxu1 %v976_v17  ;;  %356 = vmatpush.msrb.mxu0 %v1115_v12 }
  0x45   :  { %515 = vmatpush.msrb.mxu3 %v1145_v42  ;;  %436 = vmatpush.msrb.mxu2 %v998_v25 }
  0x46   :  { %397 = vmatpush.msrb.mxu1 %v998_v25  ;;  %360 = vmatpush.msrb.mxu0 %v1133_v32 }
  0x47   :  { %521 = vmatpush.msrb.mxu3 %v1158_v53  ;;  %438 = vmatpush.msrb.mxu2 %v1004_v28 }
  0x48   :  { %399 = vmatpush.msrb.mxu1 %v1004_v28  ;;  %364 = vmatpush.msrb.mxu0 %v1139_v39 }
  0x49   :  { %527 = vmatpush.msrb.mxu3 %v1172_v8  ;;  %440 = vmatpush.msrb.mxu2 %v1024_v35 }
  0x4a   :  { %401 = vmatpush.msrb.mxu1 %v1024_v35  ;;  %368 = vmatpush.msrb.mxu0 %v1163_v61 }
  0x4b   :  { %533 = vmatpush.msrb.mxu3 %v1183_v1  ;;  %442 = vmatpush.msrb.mxu2 %v1048_v45 }
  0x4c   :  { %403 = vmatpush.msrb.mxu1 %v1048_v45  ;;  %372 = vmatpush.msrb.mxu0 %v1177_v7 }
  0x4d   :  { %539 = vmatpush.msrb.mxu3 %v1194_v0  ;;  %444 = vmatpush.msrb.mxu2 %v1064_v51 }
  0x4e   :  { %405 = vmatpush.msrb.mxu1 %v1064_v51  ;;  %376 = vmatpush.msrb.mxu0 %v1188_v58 }
  0x4f   :  { %378 = vmatmul.f32.vlgmr.msrb.gmra.mxu0 %v1120_v18  ;;  %545 = vmatpush.msrb.mxu3 %v1202_v6 }
  0x50   :  { %407 = vmatpush.msrb.mxu1 %v1071_v54  ;;  %565 = vmatpush.msra.mxu0 %v968_v14  ;;  %v1382_v14 = vld [vmem:[#allocation19_spill] sm:$0xff] }
  0x51   :  { %551 = vmatpush.msrb.mxu3 %v1209_v31  ;;  %446 = vmatpush.msrb.mxu2 %v1071_v54 }
  0x52   :  { %409 = vmatpush.msrb.mxu1 %v1096_v63  ;;  %568 = vmatpush.msra.mxu0 %v971_v15 }
  0x53   :  { %557 = vmatpush.msrb.mxu3 %v1215_v44  ;;  %448 = vmatpush.msrb.mxu2 %v1096_v63 }
  0x54   :  { %411 = vmatpush.msrb.mxu1 %v1117_v13  ;;  %571 = vmatpush.msra.mxu0 %v974_v16 }
  0x55   :  { %726 = vmatpush.msra.mxu3 %v954_v3  ;;  %450 = vmatpush.msrb.mxu2 %v1117_v13 }
  0x56   :  { %413 = vmatpush.msrb.mxu1 %v1122_v26  ;;  %574 = vmatpush.msra.mxu0 %v980_v19 }
  0x57   :  { %415 = vmatmul.f32.vlgmr.msrb.gmra.mxu1 %v1120_v18  ;;  %728 = vmatpush.msra.mxu3 %v956_v4  ;;  %v809_v18 = vld [vmem:[%s1357_s2] ss:$0 sm:$0xff] }
  0x58   :  { %618 = vmatpush.msra.mxu1 %v954_v3  ;;  %577 = vmatpush.msra.mxu0 %v983_v20  ;;  %v1376_v3 = vld [vmem:[#allocation12_spill] sm:$0xff] }
  0x59   :  { %730 = vmatpush.msra.mxu3 %v958_v5  ;;  %452 = vmatpush.msrb.mxu2 %v1122_v26 }
  0x5a   :  { %620 = vmatpush.msra.mxu1 %v956_v4  ;;  %580 = vmatpush.msra.mxu0 %v986_v21  ;;  %v1377_v4 = vld [vmem:[#allocation13_spill] sm:$0xff] }
  0x5b   :  { %732 = vmatpush.msra.mxu3 %v960_v9  ;;  %659 = vmatpush.msra.mxu2 %v990_v22 }
  0x5c   :  { %622 = vmatpush.msra.mxu1 %v958_v5  ;;  %583 = vmatpush.msra.mxu0 %v1007_v29  ;;  %v1378_v5 = vld [vmem:[#allocation14_spill] sm:$0xff] }
  0x5d   :  { %734 = vmatpush.msra.mxu3 %v962_v10  ;;  %663 = vmatpush.msra.mxu2 %v993_v23 }
  0x5e   :  { %624 = vmatpush.msra.mxu1 %v960_v9  ;;  %586 = vmatpush.msra.mxu0 %v1376_v3  ;;  %v1379_v9 = vld [vmem:[#allocation15_spill] sm:$0xff] }
  0x5f   :  { %736 = vmatpush.msra.mxu3 %v964_v11  ;;  %667 = vmatpush.msra.mxu2 %v996_v24 }
  0x60   :  { %626 = vmatpush.msra.mxu1 %v962_v10  ;;  %589 = vmatpush.msra.mxu0 %v1377_v4  ;;  %v1380_v10 = vld [vmem:[#allocation16_spill] sm:$0xff] }
  0x61   :  { %738 = vmatpush.msra.mxu3 %v976_v17  ;;  %671 = vmatpush.msra.mxu2 %v1002_v27 }
  0x62   :  { %628 = vmatpush.msra.mxu1 %v964_v11  ;;  %592 = vmatpush.msra.mxu0 %v1378_v5  ;;  %v1381_v11 = vld [vmem:[#allocation17_spill] sm:$0xff] }
  0x63   :  { %740 = vmatpush.msra.mxu3 %v998_v25  ;;  %675 = vmatpush.msra.mxu2 %v1018_v33 }
  0x64   :  { %630 = vmatpush.msra.mxu1 %v976_v17  ;;  %595 = vmatpush.msra.mxu0 %v1379_v9 }
  0x65   :  { %742 = vmatpush.msra.mxu3 %v1004_v28  ;;  %679 = vmatpush.msra.mxu2 %v1022_v34 }
  0x66   :  { %632 = vmatpush.msra.mxu1 %v998_v25  ;;  %598 = vmatpush.msra.mxu0 %v1380_v10 }
  0x67   :  { %744 = vmatpush.msra.mxu3 %v1024_v35  ;;  %683 = vmatpush.msra.mxu2 %v1039_v41 }
  0x68   :  { %634 = vmatpush.msra.mxu1 %v1004_v28  ;;  %601 = vmatpush.msra.mxu0 %v1381_v11  ;;  %v1383_v28 = vld [vmem:[#allocation18_spill] sm:$0xff] }
  0x69   :  { %746 = vmatpush.msra.mxu3 %v1048_v45  ;;  %687 = vmatpush.msra.mxu2 %v1062_v50 }
  0x6a   :  { %636 = vmatpush.msra.mxu1 %v1024_v35  ;;  %604 = vmatpush.msra.mxu0 %v1382_v14 }
  0x6b   :  { %748 = vmatpush.msra.mxu3 %v1064_v51  ;;  %691 = vmatpush.msra.mxu2 %v1080_v57 }
  0x6c   :  { %638 = vmatpush.msra.mxu1 %v1048_v45  ;;  %607 = vmatpush.msra.mxu0 %v1150_v47 }
  0x6d   :  { %750 = vmatpush.msra.mxu3 %v1071_v54  ;;  %695 = vmatpush.msra.mxu2 %v1094_v62 }
  0x6e   :  { %640 = vmatpush.msra.mxu1 %v1064_v51  ;;  %610 = vmatpush.msra.mxu0 %v1166_v60 }
  0x6f   :  { %752 = vmatpush.msra.mxu3 %v1096_v63  ;;  %699 = vmatpush.msra.mxu2 %v1115_v12 }
  0x70   :  { %642 = vmatpush.msra.mxu1 %v1071_v54 }
  0x71   :  { %754 = vmatpush.msra.mxu3 %v1117_v13  ;;  %703 = vmatpush.msra.mxu2 %v1133_v32 }
  0x72   :  { %644 = vmatpush.msra.mxu1 %v1096_v63 }
  0x73   :  { %756 = vmatpush.msra.mxu3 %v1122_v26  ;;  %707 = vmatpush.msra.mxu2 %v1139_v39 }
  0x74   :  { %646 = vmatpush.msra.mxu1 %v1117_v13 }
  0x75   :  { %711 = vmatpush.msra.mxu2 %v1163_v61 }
  0x76   :  { %648 = vmatpush.msra.mxu1 %v1122_v26 }
  0x77   :  { %715 = vmatpush.msra.mxu2 %v1177_v7  ;;  %v808_v7 = vld [vmem:[#allocation5] ss:$0 sm:$0xff] }
  0x79   :  { %719 = vmatpush.msra.mxu2 %v1188_v58 }
  0xb0   :  { %v116_v16 = vpop.f32.mrf.mxu0 }
  0xb4   :  { %v217_v15 = vpop.f32.mrf.mxu1  ;;  %v310_v21 = vpop.f32.mrf.mxu3 }
  0xb5   :  { %v218_v17 = vadd.f32 %v217_v15, %v116_v16 }
  0xb6   :  { %v271_v19 = vpop.f32.mrf.mxu2 }
  0xb7   :  { %v272_v20 = vadd.f32 %v271_v19, %v218_v17 }
  0xb9   :  { %v311_v22 = vadd.f32 %v310_v21, %v272_v20 }
  0xcc   :  { %v379_v23 = vpop.f32.mrf.mxu0 }
  0xcd   :  { %v380_v24 = vadd.f32 %v379_v23, %v311_v22 }
  0xd4   :  { %v416_v25 = vpop.f32.mrf.mxu1 }
  0xd5   :  { %v417_v27 = vadd.f32 %v416_v25, %v380_v24 }
  0xd7   :  { %v419_v29 = vsub.f32 %v1383_v28, %v417_v27 }
  0xd9   :  { %v420_v33 = vmul.f32 %v419_v29, %v419_v29 }
  0xdb   :  { %v453_v34 = vand.u32 4294901760, %v420_v33 }
  0xdd   :  { %v454_v35 = vsub.f32 %v420_v33, %v453_v34  ;;  %559 = vmatmul.f32.vlgmr.msrb.gmra.mxu3 %v453_v34 }
  0xdf   :  { %613 = vmatmul.f32.vlgmr.msra.gmra.mxu0 %v454_v35  ;;  %v455_v37 = vand.u32 4294901760, %v454_v35 }
  0xe1   :  { %652 = vmatmul.f32.vlgmr.msra.gmra.mxu1 %v455_v37  ;;  %v456_v38 = vsub.f32 %v454_v35, %v455_v37 }
  0xe3   :  { %v457_v40 = vand.u32 4294901760, %v456_v38 }
  0xe5   :  { %458 = vmatmul.f32.vlgmr.msrb.gmra.mxu2 %v457_v40  ;;  %758 = vmatmul.f32.vlgmr.msra.gmra.mxu3 %v453_v34 }
  0xed   :  { %721 = vmatmul.f32.vlgmr.msra.gmra.mxu2 %v453_v34 }
 0x15c   :  { %v614_v49 = vpop.f32.mrf.mxu0 }
 0x15e   :  { %v653_v51 = vpop.f32.mrf.mxu1 }
 0x160   :  { %v560_v41 = vpop.f32.mrf.mxu3 }
 0x168   :  { %v459_v43 = vpop.f32.mrf.mxu2  ;;  %v759_v57 = vpop.f32.mrf.mxu3 }
 0x169   :  { %v460_v45 = vadd.f32 1e-05, %v459_v43 }
 0x16b   :  { %v561_v46 = vadd.f32 %v560_v41, %v460_v45 }
 0x16d   :  { %v615_v50 = vadd.f32 %v614_v49, %v561_v46 }
 0x16f   :  { %v654_v52 = vadd.f32 %v653_v51, %v615_v50 }
 0x170   :  { %v722_v54 = vpop.f32.mrf.mxu2 }
 0x171   :  { %v723_v56 = vadd.f32 %v722_v54, %v654_v52 }
 0x173   :  { %v760_v58 = vadd.f32 %v759_v57, %v723_v56 }
 0x175   :  { %810 = vrsqrt.f32 %v760_v58  ;;  %vm768_vm1 = vweird.f32 %v760_v58 }
 0x17b   :  { %v811_v59 = vpop.eup %810 }
 0x17c   :  { %v763_v62 = vmul.f32 %v811_v59, %v760_v58  ;;  %vm769_vm0 = vweird.f32 %v811_v59 }
 0x17d   :  { %vm770_vm2 = vmor %vm768_vm1, %vm769_vm0 }
 0x17e   :  { %v764_v63 = vmul.f32 %v811_v59, %v763_v62 }
 0x180   :  { %v765_v0 = vmul.f32 0.5, %v764_v63 }
 0x182   :  { %v766_v2 = vsub.f32 1.5, %v765_v0 }
 0x184   :  { %v767_v6 = vmul.f32 %v811_v59, %v766_v2 }
 0x186   :  { %v771_v12 = vsel %vm770_vm2, %v811_v59, %v767_v6 }
 0x187   :  { %v772_v13 = vmul.f32 %v771_v12, %v419_v29 }
 0x189   :  { %v777_v26 = vmul.f32 %v808_v7, %v772_v13 }
 0x18b   :  { %v782_v30 = vadd.f32 %v809_v18, %v777_v26 }
 0x18d   :  { %783 = vst [vmem:[#allocation8] sm:$0xff] %v782_v30 }
 0x18e   :  { %794 = dma.vmem_to_hbm [thread:$0]  %s790_s6, 128, %s792_s9, [#allocation4]  }
 0x18f   :  { %912 = dma.done.wait [#allocation4], 128  }
 0x190   :  { %913 = vsyncadd [#allocation4], 4294967168 }
 0x191   :  { %799 = vsyncpa [#allocation3], 1 }
 0x192   :  { %800 = vsyncpa [#allocation6], 1 }
 0x193   :  { %801 = vsyncpa [#allocation4], 1 }

</bundles_post_ra>
